<compile_context>
chip_gen: v7x
topology: tpu7x:2x2x1
jax: 0.10.0
libtpu: 0.0.40
codegen_flags: <defaults>
</compile_context>

<pallas_src>
import functools

import numpy as np
import jax
import jax.numpy as jnp
from jax.experimental import pallas as pl
from jax.experimental.pallas import tpu as pltpu

_PAD_LEFT, _PAD_RIGHT = 7, 6        # nn.ReflectionPad2d(padding=(7, 6, 0, 0))
_POOL_H, _POOL_W = 8, 50            # nn.AdaptiveAvgPool2d(output_size=(8, 50))


# ------------------------ static structural matrices ------------------------ #

def _reflection_pad_matrices(wy, wa):
    """0/1 matrices mapping [Y | a] (width wy+wa) to the reflection-padded width."""
    w_in = wy + wa
    wp = w_in + _PAD_LEFT + _PAD_RIGHT
    pad_y = np.zeros((wy, wp), np.float64)
    pad_a = np.zeros((wa, wp), np.float64)
    for j in range(wp):
        i = j - _PAD_LEFT
        if i < 0:
            i = -i                          # reflect (excludes edge), left side
        elif i >= w_in:
            i = 2 * (w_in - 1) - i          # reflect, right side
        if i < wy:
            pad_y[i, j] = 1.0
        else:
            pad_a[i - wy, j] = 1.0
    return pad_y, pad_a


def _adaptive_avg_pool_matrix(w_in, w_out):
    """[w_in, w_out] averaging matrix reproducing AdaptiveAvgPool windows."""
    m = np.zeros((w_in, w_out), np.float64)
    for i in range(w_out):
        s = (i * w_in) // w_out
        e = -((-(i + 1) * w_in) // w_out)   # ceil((i+1)*w_in / w_out)
        m[s:e, i] = 1.0 / (e - s)
    return m


@functools.lru_cache(maxsize=None)
def _combined_matrices(wy, wa):
    """Fold ReflectionPad ∘ AdaptiveAvgPool(width) into one matrix per input."""
    pad_y, pad_a = _reflection_pad_matrices(wy, wa)
    pool = _adaptive_avg_pool_matrix(wy + wa + _PAD_LEFT + _PAD_RIGHT, _POOL_W)
    cy = (pad_y @ pool).astype(np.float32)      # [Wy, 50]
    ca = (pad_a @ pool).astype(np.float32)      # [Wa, 50]
    return cy, ca


# --------------------------------- kernel ----------------------------------- #

def _focus_kernel(y_ref, a_ref, cy_ref, ca_ref, wc_ref, bc_ref, out_ref):
    B, C, H, Wy = y_ref.shape
    Wa = a_ref.shape[-1]
    Wo = cy_ref.shape[-1]
    BM = B * C * H

    y = y_ref[...]                                   # [B, C, H, Wy]
    cy = cy_ref[...]                                 # [Wy, Wo]
    ca = ca_ref[...]                                 # [Wa, Wo]

    # (1) cat((Y,a),3) + ReflectionPad2d + AdaptiveAvgPool2d(width) folded into
    #     ONE matmul with the precomputed combined matrix (width on lanes,
    #     rows on sublanes; H==8 keeps every (b,c) block sublane-tile aligned).
    pooled = jnp.dot(y.reshape(BM, Wy), cy,
                     preferred_element_type=jnp.float32)          # [BM, Wo]
    pooled = pooled.reshape(B, C, H, Wo)

    a4 = a_ref[...]                                  # [B, C, H, Wa]
    if Wa <= 4:
        # rank-Wa VPU update; avoids a second MXU push/drain for the tiny `a` term
        for k in range(Wa):
            pooled = pooled + a4[..., k:k + 1] * ca[k, :]
    else:
        pooled = pooled + jnp.dot(
            a4.reshape(BM, Wa), ca,
            preferred_element_type=jnp.float32).reshape(B, C, H, Wo)

    # (2) SwinIR surrogate: residual per-pixel 2->2 channel mix, commuted to
    #     AFTER pooling (exact: mix coefficients/bias are width-constant and
    #     every pool window's weights sum to 1).
    # TODO(synk): the real SwinIR(img_size=64, patch_size=1, in_chans=2,
    # window_size=4) backbone is an external network whose source is not part
    # of this module; a residual per-pixel 2->2 channel mix stands in for it.
    p0 = pooled[:, 0]                                # [B, H, Wo]
    p1 = pooled[:, 1]
    w00, w01, w10, w11 = wc_ref[0], wc_ref[1], wc_ref[2], wc_ref[3]
    wgt0 = p0 * (1.0 + w00) + p1 * w01 + bc_ref[0]
    wgt1 = p0 * w10 + p1 * (1.0 + w11) + bc_ref[1]

    # (3) Y_weighted = Y * weight ; Y_focus = sum over dim=2 (height).
    #     Emit one lane-dense [B*C, Wo] slab (wrapper restores the 4-D shape).
    o0 = jnp.sum(y[:, 0] * wgt0, axis=1)             # [B, Wo]
    o1 = jnp.sum(y[:, 1] * wgt1, axis=1)             # [B, Wo]
    out_ref[...] = jnp.stack([o0, o1], axis=1).reshape(B * C, Wo)


# --------------------------------- wrapper ----------------------------------- #

def focus_forward(Y, a, swin_w, swin_b):
    """Y: [B, 2, 8, 50]  a: [B, 2, 8, Wa]  ->  Y_focus: [B, 2, 1, 50]."""
    B, C, H, Wy = Y.shape
    Wa = a.shape[-1]
    assert C == 2, "focus hard-codes in_chans=2"
    assert a.shape[:3] == (B, C, H)
    assert H == _POOL_H, "AdaptiveAvgPool2d((8,50)) height pooling is identity only for H == 8"
    assert Wy == _POOL_W, "Y * weight requires Y width == pooled width (50)"

    cy, ca = _combined_matrices(Wy, Wa)              # cached, trace-time constants

    vmem = pl.BlockSpec(memory_space=pltpu.MemorySpace.VMEM)
    smem = pl.BlockSpec(memory_space=pltpu.MemorySpace.SMEM)

    out = pl.pallas_call(
        _focus_kernel,
        out_shape=jax.ShapeDtypeStruct((B * C, _POOL_W), jnp.float32),
        in_specs=[vmem, vmem, vmem, vmem, smem, smem],
        out_specs=vmem,
    )(Y, a, jnp.asarray(cy), jnp.asarray(ca), swin_w, swin_b)

    return out.reshape(B, C, 1, _POOL_W)


# ------------------------------ numpy reference ------------------------------ #

def _focus_reference(Y, a, swin_w, swin_b):
    """Reference in the ORIGINAL op order (pad -> mix -> pool) to validate the fold."""
    Y = np.asarray(Y, np.float64)
    a = np.asarray(a, np.float64)
    w = np.asarray(swin_w, np.float64)
    b = np.asarray(swin_b, np.float64)
    B, C, H, _ = Y.shape

    x = np.concatenate([Y, a], axis=3)
    w_in = x.shape[3]
    idx = []
    for j in range(w_in + _PAD_LEFT + _PAD_RIGHT):
        i = j - _PAD_LEFT
        if i < 0:
            i = -i
        elif i >= w_in:
            i = 2 * (w_in - 1) - i
        idx.append(i)
    xp = x[..., idx]

    x0, x1 = xp[:, 0], xp[:, 1]
    s0 = x0 * (1.0 + w[0]) + x1 * w[1] + b[0]
    s1 = x0 * w[2] + x1 * (1.0 + w[3]) + b[1]
    sp = np.stack([s0, s1], axis=1)

    wp = sp.shape[-1]
    wgt = np.zeros((B, C, H, _POOL_W), np.float64)
    for i in range(_POOL_W):
        s = (i * wp) // _POOL_W
        e = -((-(i + 1) * wp) // _POOL_W)
        wgt[..., i] = sp[..., s:e].mean(axis=-1)

    return (Y * wgt).sum(axis=2, keepdims=True)


# ----------------------------------- main ------------------------------------ #

if __name__ == "__main__":
    key = jax.random.PRNGKey(0)
    k_y, k_a, k_w, k_b = jax.random.split(key, 4)

    # Y: [B, 2, 8, 50]; a: [B, 2, 8, 1] -> concat width 51, padded width 64
    # (= SwinIR img_size), pooled back to (8, 50).
    B, C, H, Wy, Wa = 2, 2, 8, 50, 1
    Y = jax.random.normal(k_y, (B, C, H, Wy), jnp.float32)
    a = jax.random.normal(k_a, (B, C, H, Wa), jnp.float32)
    swin_w = 0.1 * jax.random.normal(k_w, (4,), jnp.float32)   # surrogate 2x2 mix
    swin_b = 0.1 * jax.random.normal(k_b, (2,), jnp.float32)

    out = jax.jit(focus_forward)(Y, a, swin_w, swin_b)
    jax.block_until_ready(out)

    assert out.shape == (B, C, 1, _POOL_W)
    ref = _focus_reference(Y, a, swin_w, swin_b)
    np.testing.assert_allclose(np.asarray(out, np.float64), ref, rtol=1e-4, atol=1e-4)
    print("KERNEL_OK")
</pallas_src>

<mosaic_0001>
module attributes {stable_mosaic.version = 11 : i64} {
  func.func @_focus_kernel(%arg0: memref<2x2x8x50xf32, #tpu.memory_space<vmem>>, %arg1: memref<2x2x8x1xf32, #tpu.memory_space<vmem>>, %arg2: memref<50x50xf32, #tpu.memory_space<vmem>>, %arg3: memref<1x50xf32, #tpu.memory_space<vmem>>, %arg4: memref<4xf32, #tpu.memory_space<smem>>, %arg5: memref<2xf32, #tpu.memory_space<smem>>, %arg6: memref<4x50xf32, #tpu.memory_space<vmem>>) attributes {dimension_semantics = [], scalar_prefetch = 0 : i64, scratch_operands = 0 : i64, tpu.core_type = #tpu.core_type<tc>} {
    %c0 = arith.constant 0 : index
    %c0_0 = arith.constant 0 : index
    %c0_1 = arith.constant 0 : index
    %c0_2 = arith.constant 0 : index
    %0 = vector.load %arg0[%c0, %c0_0, %c0_1, %c0_2] : memref<2x2x8x50xf32, #tpu.memory_space<vmem>>, vector<2x2x8x50xf32>
    %c0_3 = arith.constant 0 : index
    %c0_4 = arith.constant 0 : index
    %1 = vector.load %arg2[%c0_3, %c0_4] : memref<50x50xf32, #tpu.memory_space<vmem>>, vector<50x50xf32>
    %c0_5 = arith.constant 0 : index
    %c0_6 = arith.constant 0 : index
    %2 = vector.load %arg3[%c0_5, %c0_6] : memref<1x50xf32, #tpu.memory_space<vmem>>, vector<1x50xf32>
    %3 = vector.shape_cast %0 : vector<2x2x8x50xf32> to vector<32x50xf32>
    %cst = arith.constant dense<0.000000e+00> : vector<32x50xf32>
    %4 = tpu.matmul %3, %1, %cst {dimension_numbers = #tpu.dot_dimension_numbers<[1], [0], [0], [1], [0, 0, 1, 1], [], []>} : vector<32x50xf32>, vector<50x50xf32>, vector<32x50xf32> -> vector<32x50xf32>
    %5 = vector.shape_cast %4 : vector<32x50xf32> to vector<2x2x8x50xf32>
    %c0_7 = arith.constant 0 : index
    %c0_8 = arith.constant 0 : index
    %c0_9 = arith.constant 0 : index
    %c0_10 = arith.constant 0 : index
    %6 = vector.load %arg1[%c0_7, %c0_8, %c0_9, %c0_10] : memref<2x2x8x1xf32, #tpu.memory_space<vmem>>, vector<2x2x8x1xf32>
    %7 = vector.shape_cast %2 : vector<1x50xf32> to vector<50xf32>
    %8 = vector.shape_cast %7 : vector<50xf32> to vector<1x1x1x50xf32>
    %9 = vector.broadcast %6 : vector<2x2x8x1xf32> to vector<2x2x8x50xf32>
    %10 = vector.broadcast %8 : vector<1x1x1x50xf32> to vector<2x2x8x50xf32>
    %11 = arith.mulf %9, %10 : vector<2x2x8x50xf32>
    %12 = arith.addf %5, %11 : vector<2x2x8x50xf32>
    %13 = vector.extract_strided_slice %12 {offsets = [0, 0, 0, 0], sizes = [2, 1, 8, 50], strides = [1, 1, 1, 1]} : vector<2x2x8x50xf32> to vector<2x1x8x50xf32>
    %14 = vector.shape_cast %13 : vector<2x1x8x50xf32> to vector<2x8x50xf32>
    %15 = vector.extract_strided_slice %12 {offsets = [0, 1, 0, 0], sizes = [2, 1, 8, 50], strides = [1, 1, 1, 1]} : vector<2x2x8x50xf32> to vector<2x1x8x50xf32>
    %16 = vector.shape_cast %15 : vector<2x1x8x50xf32> to vector<2x8x50xf32>
    %c0_11 = arith.constant 0 : index
    %17 = memref.load %arg4[%c0_11] : memref<4xf32, #tpu.memory_space<smem>>
    %c1 = arith.constant 1 : index
    %18 = memref.load %arg4[%c1] : memref<4xf32, #tpu.memory_space<smem>>
    %c2 = arith.constant 2 : index
    %19 = memref.load %arg4[%c2] : memref<4xf32, #tpu.memory_space<smem>>
    %c3 = arith.constant 3 : index
    %20 = memref.load %arg4[%c3] : memref<4xf32, #tpu.memory_space<smem>>
    %cst_12 = arith.constant 1.000000e+00 : f32
    %21 = arith.addf %cst_12, %17 : f32
    %22 = vector.broadcast %21 : f32 to vector<2x8x50xf32>
    %23 = arith.mulf %14, %22 : vector<2x8x50xf32>
    %24 = vector.broadcast %18 : f32 to vector<2x8x50xf32>
    %25 = arith.mulf %16, %24 : vector<2x8x50xf32>
    %26 = arith.addf %23, %25 : vector<2x8x50xf32>
    %c0_13 = arith.constant 0 : index
    %27 = memref.load %arg5[%c0_13] : memref<2xf32, #tpu.memory_space<smem>>
    %28 = vector.broadcast %27 : f32 to vector<2x8x50xf32>
    %29 = arith.addf %26, %28 : vector<2x8x50xf32>
    %30 = vector.broadcast %19 : f32 to vector<2x8x50xf32>
    %31 = arith.mulf %14, %30 : vector<2x8x50xf32>
    %cst_14 = arith.constant 1.000000e+00 : f32
    %32 = arith.addf %cst_14, %20 : f32
    %33 = vector.broadcast %32 : f32 to vector<2x8x50xf32>
    %34 = arith.mulf %16, %33 : vector<2x8x50xf32>
    %35 = arith.addf %31, %34 : vector<2x8x50xf32>
    %c1_15 = arith.constant 1 : index
    %36 = memref.load %arg5[%c1_15] : memref<2xf32, #tpu.memory_space<smem>>
    %37 = vector.broadcast %36 : f32 to vector<2x8x50xf32>
    %38 = arith.addf %35, %37 : vector<2x8x50xf32>
    %39 = vector.extract_strided_slice %0 {offsets = [0, 0, 0, 0], sizes = [2, 1, 8, 50], strides = [1, 1, 1, 1]} : vector<2x2x8x50xf32> to vector<2x1x8x50xf32>
    %40 = vector.shape_cast %39 : vector<2x1x8x50xf32> to vector<2x8x50xf32>
    %41 = arith.mulf %40, %29 : vector<2x8x50xf32>
    %cst_16 = arith.constant dense<0.000000e+00> : vector<2x50xf32>
    %42 = vector.multi_reduction <add>, %41, %cst_16 [1] : vector<2x8x50xf32> to vector<2x50xf32>
    %43 = vector.extract_strided_slice %0 {offsets = [0, 1, 0, 0], sizes = [2, 1, 8, 50], strides = [1, 1, 1, 1]} : vector<2x2x8x50xf32> to vector<2x1x8x50xf32>
    %44 = vector.shape_cast %43 : vector<2x1x8x50xf32> to vector<2x8x50xf32>
    %45 = arith.mulf %44, %38 : vector<2x8x50xf32>
    %cst_17 = arith.constant dense<0.000000e+00> : vector<2x50xf32>
    %46 = vector.multi_reduction <add>, %45, %cst_17 [1] : vector<2x8x50xf32> to vector<2x50xf32>
    %47 = vector.shape_cast %42 : vector<2x50xf32> to vector<2x1x50xf32>
    %48 = vector.shape_cast %46 : vector<2x50xf32> to vector<2x1x50xf32>
    %49 = tpu.concatenate %47, %48 in 1 : vector<2x1x50xf32>, vector<2x1x50xf32> -> vector<2x2x50xf32>
    %50 = vector.shape_cast %49 : vector<2x2x50xf32> to vector<4x50xf32>
    %c0_18 = arith.constant 0 : index
    %c0_19 = arith.constant 0 : index
    %51 = vector.load %arg6[%c0_18, %c0_19] : memref<4x50xf32, #tpu.memory_space<vmem>>, vector<4x50xf32>
    tpu.vector_store %arg6[%c0_18, %c0_19], %50 {strides = array<i32>} : memref<4x50xf32, #tpu.memory_space<vmem>>, vector<4x50xf32>,
    return
  }
}

</mosaic_0001>

<bundles_post_ra>
// kernel: focus_forward.1
= control target key start
LH: loop header
LB: loop body
LE: loop exit
PB: predicated region body
PF: predicated region fallthrough
CT: control target
= control target key end

     0   :  { %11 = vsyncpa [#allocation3], 0  ;;  %s582_s0 = inlined_call_operand.vmem [shape: f32[2,2,8,50], index: 0, kind: input, shape index: {}]   ;;  %s583_s1 = inlined_call_operand.vmem [shape: f32[2,2,8,1], index: 1, kind: input, shape index: {}]   ;;  %s584_s2 = inlined_call_operand.hbm [shape: f32[50,50], index: 2, kind: input, shape index: {}]   ;;  %s585_s3 = inlined_call_operand.vmem [shape: f32[1,50], index: 3, kind: input, shape index: {}]   ;;  %s586_s4 = inlined_call_operand.vmem [shape: f32[4], index: 4, kind: input, shape index: {}]   ;;  %s587_s5 = inlined_call_operand.vmem [shape: f32[2], index: 5, kind: input, shape index: {}]   ;;  %s588_s6 = inlined_call_operand.hbm [shape: f32[4,50], index: 6, kind: output, shape index: {}]  }
   0x1   :  { %12 = vsyncpa [#allocation5], 0 }
   0x2   :  { %13 = vsyncpa [#allocation8], 0 }
   0x3   :  { %14 = vsyncpa [#allocation4], 0  ;;  %s457_s21 = smov [#allocation2]   ;;  %s39_s25 = sshll.u32 %s586_s4, 4  ;;  %s40_s25 = int_to_ptr.vmem [resolvable:$true] %s39_s25 }
   0x4   :  { %s24_s22 = sshll.u32 %s457_s21, 4  ;;  %s381_s28 = scalar_lea.hbm %s584_s2, 896  ;;  %s25_s22 = int_to_ptr.vmem [resolvable:$true] %s24_s22 }
   0x5   :  { %p382_p0 = scmp.ne.s32.totalorder %s584_s2, %s381_s28  ;;  %p385_p1 = scmp.lt.u32.totalorder %s381_s28, %s584_s2 }
   0x7   :  { %p387_p2 = pnand %p385_p1, %p382_p0 }
   0x9   :  { %390 = shalt.err (!%p387_p2)
}
   0xa   :  { %s391_s9 = scalar_lea.vmem %s25_s22, 896  ;;  %p396_p4 = scmp.lt.s32.totalorder %s25_s22, %s25_s22 }
   0xb   :  { %p392_p3 = scmp.ne.s32.totalorder %s25_s22, %s391_s9  ;;  %p397_p5 = scmp.lt.s32.totalorder %s391_s9, %s391_s9 }
   0xd   :  { %p398_p6 = por %p397_p5, %p396_p4 }
   0xf   :  { %p399_p7 = pnand %p398_p6, %p392_p3 }
  0x11   :  { %402 = shalt.err (!%p399_p7)
}
  0x12   :  { %s458_s4 = smov 128   ;;  %s459_s10 = smov 8  }
  0x13   :  { %30 = dma.hbm_to_vmem [thread:$0]  %s584_s2, 896, %s25_s22, [#allocation3], %s458_s4, %s458_s4, %s459_s10  }
  0x14   :  { %s403_s13 = scalar_lea.vmem %s40_s25, 16  ;;  %p408_p9 = scmp.lt.s32.totalorder %s40_s25, %s40_s25 }
  0x15   :  { %p404_p8 = scmp.ne.s32.totalorder %s40_s25, %s403_s13  ;;  %p409_p10 = scmp.lt.s32.totalorder %s403_s13, %s403_s13 }
  0x17   :  { %p410_p11 = por %p409_p10, %p408_p9 }
  0x19   :  { %p411_p12 = pnand %p410_p11, %p404_p8 }
  0x1b   :  { %414 = shalt.err (!%p411_p12)
}
  0x1c   :  { %s460_s14 = smov [#allocation6]   ;;  %s49_s17 = sshll.u32 %s587_s5, 4  ;;  %s50_s17 = int_to_ptr.vmem [resolvable:$true] %s49_s17 }
  0x1d   :  { %42 = dma.vmem_to_smem %s40_s25, 16, %s460_s14, [#allocation5]  }
  0x1e   :  { %s415_s18 = scalar_lea.vmem %s50_s17, 16  ;;  %p420_p0 = scmp.lt.s32.totalorder %s50_s17, %s50_s17 }
  0x1f   :  { %p416_p13 = scmp.ne.s32.totalorder %s50_s17, %s415_s18  ;;  %p421_p1 = scmp.lt.s32.totalorder %s415_s18, %s415_s18 }
  0x21   :  { %p422_p2 = por %p421_p1, %p420_p0 }
  0x23   :  { %p423_p3 = pnand %p422_p2, %p416_p13 }
  0x25   :  { %426 = shalt.err (!%p423_p3)
}
  0x26   :  { %s461_s2 = smov [#allocation7]  }
  0x27   :  { %52 = dma.vmem_to_smem %s50_s17, 16, %s461_s2, [#allocation8]  }
  0x28   :  { %449 = dma.done.wait [#allocation3], 896  }
  0x29   :  { %450 = vsyncadd [#allocation3], 4294966400 }
  0x2a   :  { %451 = dma.done.wait [#allocation5], 16  }
  0x2b   :  { %452 = vsyncadd [#allocation5], 4294967280 }
  0x2c   :  { %453 = dma.done.wait [#allocation8], 16  }
  0x2d   :  { %454 = vsyncadd [#allocation8], 4294967280 }
  0x2e   :  { %62 = sfence }
  0x2f   :  { %v67_v0 = vld [vmem:[#allocation2] sm:$0xff]  ;;  %v68_v1 = vld [vmem:[#allocation2 + $0x8] sm:$0xff]  ;;  %v69_v2 = vld [vmem:[#allocation2 + $0x10] sm:$0xff]  ;;  %v462_v5 = vmov 0   ;;  %vm75_vm0 = vcmask 408576   ;;  %vm88_vm1 = vcmask 1041408  }
  0x30   :  { %v351_v3 = vpack.c.bf16 %v68_v1, %v67_v0  ;;  %v70_v4 = vld [vmem:[#allocation2 + $0x18] sm:$0xff]  ;;  %380 = vset.pattern.permute.xlu1 %v462_v5  ;;  %379 = vset.pattern.permute.xlu0 %v462_v5  ;;  %v71_v7 = vld [vmem:[#allocation2 + $0x20] sm:$0xff]  ;;  %v72_v8 = vld [vmem:[#allocation2 + $0x28] sm:$0xff]  ;;  %s215_s4 = sld [smem:[#allocation6]]  ;;  %s316_s10 = sld [smem:[#allocation6 + $0x1]]  ;;  %vm277_vm2 = vcmask 1040384  }
  0x31   :  { %v355_v6 = vpack.c.bf16 %v70_v4, %v69_v2  ;;  %v521_v9 = vld [vmem:[%s582_s0] sm:$0xff]  ;;  %v526_v10 = vld [vmem:[%s582_s0 + $0x10] sm:$0xff]  ;;  %v359_v13 = vpack.c.bf16 %v72_v8, %v71_v7  ;;  %v180_v14 = vld [vmem:[%s583_s1 + $0x18] sm:$0xff]  ;;  %s552_s11 = sld [smem:[#allocation6 + $0x2]]  ;;  %s557_s15 = sld [smem:[#allocation7]]  ;;  %vm291_vm3 = vcmask 404480  }
  0x32   :  { %352 = vmatprep.subr.bf16.mxu0 %v351_v3  ;;  %363 = vmatprep.subr.bf16.mxu1 %v351_v3  ;;  %v179_v11 = vld [vmem:[%s583_s1 + $0x10] sm:$0xff]  ;;  %v177_v12 = vld [vmem:[%s583_s1] sm:$0xff]  ;;  %v178_v15 = vld [vmem:[%s583_s1 + $0x8] sm:$0xff]  ;;  %s318_s1 = sld [smem:[#allocation6 + $0x3]]  ;;  %s559_s16 = sld [smem:[#allocation7 + $0x1]] }
  0x33   :  { %354 = vmatpush3.bf16.msra.mxu0 %v351_v3  ;;  %367 = vmatpush3.bf16.msra.mxu1 %v351_v3  ;;  %v73_v16 = vld [vmem:[#allocation2 + $0x30] sm:$0x3]  ;;  %v64_v17 = vld [vmem:[%s582_s0 + $0x8] sm:$0xff]  ;;  %v66_v18 = vld [vmem:[%s582_s0 + $0x18] sm:$0xff] }
  0x34   :  { %356 = vmatprep.subr.bf16.mxu0 %v355_v6  ;;  %364 = vmatprep.subr.bf16.mxu1 %v355_v6  ;;  %v315_v21 = vld [vmem:[%s585_s3] ss:$0 sm:$0xff]  ;;  %s464_s3 = smov [#allocation9]  }
  0x35   :  { %345 = vmatprep.mubr.msk.f32.mxu0 %vm75_vm0, %v521_v9  ;;  %348 = vmatprep.mubr.msk.f32.mxu1 %vm75_vm0, %v526_v10  ;;  %s299_s17 = sshll.u32 %s464_s3, 4  ;;  %s300_s17 = int_to_ptr.vmem [resolvable:$true] %s299_s17 }
  0x36   :  { %193 = vperm.xlu1 %380, %v179_v11   ;;  %183 = vperm.xlu0 %379, %v177_v12   ;;  %s219_s0 = sadd.f32 1.0, %s215_s4  ;;  %v223_v29 = vstv %s316_s10  ;;  %v463_v11 = vmov 1983009808   ;;  %s427_s18 = scalar_lea.vmem %s300_s17, 64 }
  0x37   :  { %358 = vmatpush3.bf16.msra.mxu0 %v355_v6  ;;  %368 = vmatpush3.bf16.msra.mxu1 %v355_v6  ;;  %v232_v36 = vstv %s552_s11  ;;  %v229_v48 = vstv %s557_s15  ;;  %v284_v12 = vunpack.c.l.s4 %v463_v11  ;;  %p428_p4 = scmp.ne.s32.totalorder %s300_s17, %s427_s18  ;;  %p432_p5 = scmp.lt.s32.totalorder %s300_s17, %s300_s17 }
  0x38   :  { %360 = vmatprep.subr.bf16.mxu0 %v359_v13  ;;  %365 = vmatprep.subr.bf16.mxu1 %v359_v13  ;;  %s235_s12 = sadd.f32 1.0, %s318_s1  ;;  %v220_v35 = vstv %s219_s0  ;;  %v242_v49 = vstv %s559_s16  ;;  %p433_p6 = scmp.lt.s32.totalorder %s427_s18, %s427_s18 }
  0x3a   :  { %198 = vperm.xlu1 %380, %v180_v14   ;;  %188 = vperm.xlu0 %379, %v178_v15   ;;  %v236_v30 = vstv %s235_s12  ;;  %p434_p7 = por %p433_p6, %p432_p5 }
  0x3b   :  { %362 = vmatpush3.bf16.msra.mxu0 %v359_v13  ;;  %369 = vmatpush3.bf16.msra.mxu1 %v359_v13 }
  0x3c   :  { %343 = vmatprep.subr.msk.mxu0 %vm88_vm1, %v73_v16  ;;  %366 = vmatprep.subr.msk.mxu1 %vm88_vm1, %v73_v16  ;;  %p435_p8 = pnand %p434_p7, %p428_p4 }
  0x3f   :  { %344 = vmatpush3.msk.msra.mxu0 %vm88_vm1, %v73_v16  ;;  %370 = vmatpush3.msk.msra.mxu1 %vm88_vm1, %v73_v16 }
  0x40   :  { %346 = vmatmul.mubr.msk.f32.vlgmr.msra.gmra.mrb[0].mxu0 %vm75_vm0, %v64_v17  ;;  %349 = vmatmul.mubr.msk.f32.vlgmr.msra.gmra.mrb[0].mxu1 %vm75_vm0, %v66_v18 }
  0xb5   :  { %v194_v19 = vpop.permute.xlu1 %193  ;;  %v184_v20 = vpop.permute.xlu0 %183 }
  0xb6   :  { %v209_v26 = vmul.f32 %v315_v21, %v194_v19  ;;  %v207_v27 = vmul.f32 %v315_v21, %v184_v20 }
  0xb9   :  { %v199_v22 = vpop.permute.xlu1 %198  ;;  %v189_v23 = vpop.permute.xlu0 %188 }
  0xba   :  { %v210_v24 = vmul.f32 %v315_v21, %v199_v22  ;;  %v208_v25 = vmul.f32 %v315_v21, %v189_v23  ;;  %v285_v21 = vunpack.c.0.s8 %v284_v12 }
 0x113   :  { %v347_v28 = vpop.f32.mrb[0].mxu0  ;;  %v350_v31 = vpop.f32.mrb[0].mxu1 }
 0x114   :  { %v212_v32 = vadd.f32 %v347_v28, %v208_v25  ;;  %v214_v33 = vadd.f32 %v350_v31, %v210_v24  ;;  %v158_v34 = vpop.f32.mrb[1].mxu0  ;;  %v168_v37 = vpop.f32.mrb[1].mxu1 }
 0x115   :  { %v211_v38 = vadd.f32 %v207_v27, %v158_v34  ;;  %v213_v39 = vadd.f32 %v209_v26, %v168_v37 }
 0x116   :  { %v224_v40 = vmul.f32 %v223_v29, %v212_v32  ;;  %v237_v41 = vmul.f32 %v236_v30, %v212_v32  ;;  %v225_v42 = vmul.f32 %v223_v29, %v214_v33  ;;  %v238_v43 = vmul.f32 %v236_v30, %v214_v33 }
 0x117   :  { %v221_v44 = vmul.f32 %v220_v35, %v211_v38  ;;  %v233_v45 = vmul.f32 %v232_v36, %v211_v38  ;;  %v222_v46 = vmul.f32 %v220_v35, %v213_v39  ;;  %v234_v47 = vmul.f32 %v232_v36, %v213_v39 }
 0x119   :  { %v226_v50 = vadd.f32 %v224_v40, %v221_v44  ;;  %v239_v51 = vadd.f32 %v237_v41, %v233_v45  ;;  %v227_v52 = vadd.f32 %v225_v42, %v222_v46  ;;  %v240_v53 = vadd.f32 %v238_v43, %v234_v47 }
 0x11b   :  { %v230_v54 = vadd.f32 %v229_v48, %v226_v50  ;;  %v243_v55 = vadd.f32 %v242_v49, %v239_v51  ;;  %v231_v56 = vadd.f32 %v229_v48, %v227_v52  ;;  %v244_v57 = vadd.f32 %v242_v49, %v240_v53 }
 0x11d   :  { %v245_v58 = vmul.f32 %v230_v54, %v521_v9  ;;  %v261_v59 = vmul.f32 %v243_v55, %v64_v17  ;;  %v246_v60 = vmul.f32 %v231_v56, %v526_v10  ;;  %v262_v61 = vmul.f32 %v244_v57, %v66_v18 }
 0x11e   :  { %v286_v10 = vlaneseq }
 0x11f   :  { %v247_v62 = vsel %vm75_vm0, %v245_v58, 0.0  ;;  %v263_v63 = vsel %vm75_vm0, %v261_v59, 0.0  ;;  %v254_v0 = vsel %vm75_vm0, %v246_v60, 0.0  ;;  %v270_v1 = vsel %vm75_vm0, %v262_v61, 0.0 }
 0x120   :  { %v248_v2 = vrot.slane %v247_v62, 4  ;;  %v264_v3 = vrot.slane %v263_v63, 4  ;;  %v255_v4 = vrot.slane %v254_v0, 4  ;;  %v271_v5 = vrot.slane %v270_v1, 4 }
 0x121   :  { %v287_v22 = vshrl.u32 %v286_v10, 7 }
 0x122   :  { %v249_v6 = vadd.f32 %v248_v2, %v247_v62  ;;  %v265_v7 = vadd.f32 %v264_v3, %v263_v63  ;;  %v256_v8 = vadd.f32 %v255_v4, %v254_v0  ;;  %v272_v9 = vadd.f32 %v271_v5, %v270_v1 }
 0x123   :  { %v288_v31 = vsub.s32 %v285_v21, %v287_v22 }
 0x124   :  { %v250_v13 = vrot.slane %v249_v6, 2  ;;  %v266_v14 = vrot.slane %v265_v7, 2  ;;  %v257_v15 = vrot.slane %v256_v8, 2  ;;  %v273_v16 = vrot.slane %v272_v9, 2 }
 0x126   :  { %v251_v17 = vadd.f32 %v250_v13, %v249_v6  ;;  %v258_v18 = vadd.f32 %v257_v15, %v256_v8  ;;  %v267_v19 = vadd.f32 %v266_v14, %v265_v7  ;;  %v274_v20 = vadd.f32 %v273_v16, %v272_v9 }
 0x128   :  { %v252_v23 = vrot.slane %v251_v17, 1  ;;  %v259_v24 = vrot.slane %v258_v18, 1  ;;  %v268_v25 = vrot.slane %v267_v19, 1  ;;  %v275_v26 = vrot.slane %v274_v20, 1 }
 0x12a   :  { %v253_v27 = vadd.f32 %v252_v23, %v251_v17  ;;  %v260_v28 = vadd.f32 %v259_v24, %v258_v18  ;;  %v269_v29 = vadd.f32 %v268_v25, %v267_v19  ;;  %v276_v30 = vadd.f32 %v275_v26, %v274_v20 }
 0x12c   :  { %v278_v32 = vsel %vm277_vm2, %v253_v27, %v269_v29  ;;  %v279_v33 = vsel %vm277_vm2, %v260_v28, %v276_v30 }
 0x12d   :  { %v282_v34 = vcombine.low %v278_v32, %v279_v33 }
 0x12f   :  { %v289_v35 = vrot.slane %v282_v34, %v288_v31 }
 0x131   :  { %292 = vst.msk [vmem:[#allocation9] sm:$0xf] %vm291_vm3, %v289_v35 }
 0x132   :  { %438 = shalt.err (!%p435_p8)
}
 0x133   :  { %s439_s19 = scalar_lea.hbm %s588_s6, 64 }
 0x134   :  { %p440_p9 = scmp.ne.s32.totalorder %s588_s6, %s439_s19  ;;  %p443_p10 = scmp.lt.u32.totalorder %s439_s19, %s588_s6 }
 0x136   :  { %p445_p11 = pnand %p443_p10, %p440_p9 }
 0x138   :  { %448 = shalt.err (!%p445_p11)
}
 0x139   :  { %302 = dma.vmem_to_hbm [thread:$0]  %s300_s17, 64, %s588_s6, [#allocation4]  }
 0x13a   :  { %455 = dma.done.wait [#allocation4], 64  }
 0x13b   :  { %456 = vsyncadd [#allocation4], 4294967232 }
 0x13c   :  { %306 = vsyncpa [#allocation3], 1 }
 0x13d   :  { %307 = vsyncpa [#allocation4], 1 }
 0x13e   :  { %308 = vsyncpa [#allocation5], 1 }
 0x13f   :  { %309 = vsyncpa [#allocation8], 1 }

</bundles_post_ra>
